<compile_context>
chip_gen: v7x
topology: tpu7x:2x2x1
jax: 0.10.0
libtpu: 0.0.40
codegen_flags: <defaults>
</compile_context>

<pallas_src>
import jax
import jax.numpy as jnp
from jax.experimental import pallas as pl
from jax.experimental.pallas import tpu as pltpu


def _cdiv(a, b):
    return (a + b - 1) // b


def _round_up(x, m):
    return ((x + m - 1) // m) * m


def _linear_kernel_inplace(u_ref, ht_ref, o_ref):
    """float32 output: accumulate directly into the K-resident output block."""
    k = pl.program_id(2)

    @pl.when(k == 0)
    def _():
        o_ref[...] = jnp.zeros_like(o_ref)

    o_ref[...] += jnp.dot(
        u_ref[...], ht_ref[...], preferred_element_type=jnp.float32
    )


def _linear_kernel_acc(u_ref, ht_ref, o_ref, acc_ref):
    """Non-f32 output: f32 VMEM accumulator, cast on the last K step."""
    k = pl.program_id(2)

    @pl.when(k == 0)
    def _():
        acc_ref[...] = jnp.zeros_like(acc_ref)

    acc_ref[...] += jnp.dot(
        u_ref[...], ht_ref[...], preferred_element_type=jnp.float32
    )

    @pl.when(k == pl.num_programs(2) - 1)
    def _():
        o_ref[...] = acc_ref[...].astype(o_ref.dtype)


def _vmem_capacity_bytes():
    try:
        return int(pltpu.get_tpu_info().vmem_capacity_bytes)
    except Exception:
        return 64 << 20  # conservative (v7x-sized) fallback


def linear_forward(u, H, *, ht=None, compute_dtype=None,
                   tile_b=None, tile_n=None, tile_k=None,
                   force_pallas=False):
    """Pallas equivalent of `u @ H.t()`.

    u:  [..., x_dim]
    H:  [y_dim, x_dim]
    ht: optional precomputed / cached H.T of shape [x_dim, y_dim]
    returns: [..., y_dim]
    """
    *lead, x_dim = u.shape
    y_dim, x_dim_h = H.shape
    assert x_dim == x_dim_h, "inner dims must match"

    out_dtype = jnp.result_type(u.dtype, H.dtype)

    u2 = u.reshape(-1, x_dim)
    batch = u2.shape[0]

    # Fast path: tiny problems — pallas_call fixed overhead dominates.
    if not force_pallas and batch * x_dim * y_dim < (1 << 18):
        return (u2 @ H.T).astype(out_dtype).reshape(*lead, y_dim)

    if ht is None:
        # One-time transpose; pass a cached `ht` to avoid this HBM pass per call.
        ht = H.T  # [x_dim, y_dim] == (K, N)
    else:
        assert ht.shape == (x_dim, y_dim), "ht must be H.T"

    if compute_dtype is not None:
        u2 = u2.astype(compute_dtype)
        ht = ht.astype(compute_dtype)

    # ---- chip-aware tile defaults ------------------------------------------
    cap = _vmem_capacity_bytes()
    big_vmem = cap >= (128 << 20)  # v5e / v6e (128 MiB); v7x has 64 MiB
    if tile_b is None:
        tile_b = 512
    if tile_n is None:
        tile_n = 512
    if tile_k is None:
        tile_k = 2048 if big_vmem else 1024
    tile_b = max(8, tile_b - tile_b % 8)
    tile_n = max(128, tile_n - tile_n % 128)
    tile_k = max(128, tile_k - tile_k % 128)

    # ---- block sizes (no wrapper padding of B / N) ---------------------------
    # Full-extent blocks for small dims (exempt from the (8,128) rule),
    # otherwise aligned tiles with Pallas-handled partial edge blocks.
    tb = batch if batch <= tile_b else tile_b
    tn = y_dim if y_dim <= tile_n else tile_n

    # K: pad only when needed, and only to the next 128 multiple.
    if x_dim <= tile_k:
        tk = x_dim
        k_pad = x_dim
    else:
        k_pad = _round_up(x_dim, 128)
        tk = tile_k
        while k_pad % tk:
            tk -= 128

    u_p, ht_p = u2, ht
    if k_pad != x_dim:
        u_p = jnp.pad(u2, ((0, 0), (0, k_pad - x_dim)))
        ht_p = jnp.pad(ht, ((0, k_pad - x_dim), (0, 0)))

    # v7x megacore: ensure the 'parallel' axes have >= 2 blocks when there is
    # enough work to share across both TensorCores.
    if _cdiv(batch, tb) * _cdiv(y_dim, tn) == 1 and batch >= 256:
        tb = _round_up(_cdiv(batch, 2), 8)

    grid = (_cdiv(batch, tb), _cdiv(y_dim, tn), k_pad // tk)

    # ---- kernel / scratch selection -----------------------------------------
    use_inplace = jnp.dtype(out_dtype) == jnp.dtype(jnp.float32)
    kernel = _linear_kernel_inplace if use_inplace else _linear_kernel_acc
    scratch = [] if use_inplace else [pltpu.VMEM((tb, tn), jnp.float32)]

    in_bytes = u_p.dtype.itemsize
    w_bytes = ht_p.dtype.itemsize
    o_bytes = jnp.dtype(out_dtype).itemsize

    # Scoped VMEM limit: ~3/4 of the chip's physical VMEM (never above 100 MiB).
    vmem_limit = int(min(int(cap * 0.75), 100 << 20))

    cost = pl.CostEstimate(
        flops=2 * batch * k_pad * y_dim,
        transcendentals=0,
        bytes_accessed=(
            grid[1] * u_p.size * in_bytes        # u streamed once per N block
            + grid[0] * ht_p.size * w_bytes      # Ht streamed once per B block
            + batch * y_dim * o_bytes
        ),
    )

    out = pl.pallas_call(
        kernel,
        out_shape=jax.ShapeDtypeStruct((batch, y_dim), out_dtype),
        grid_spec=pltpu.PrefetchScalarGridSpec(
            num_scalar_prefetch=0,
            grid=grid,
            in_specs=[
                pl.BlockSpec((tb, tk), lambda i, j, k: (i, k)),
                pl.BlockSpec((tk, tn), lambda i, j, k: (k, j)),
            ],
            out_specs=pl.BlockSpec((tb, tn), lambda i, j, k: (i, j)),
            scratch_shapes=scratch,
        ),
        compiler_params=pltpu.CompilerParams(
            dimension_semantics=("parallel", "parallel", "arbitrary"),
            vmem_limit_bytes=vmem_limit,
        ),
        cost_estimate=cost,
    )(u_p, ht_p)

    return out.reshape(*lead, y_dim)


if __name__ == "__main__":
    # Deterministic parameter / input construction (synthetic, no checkpoint).
    x_dim, y_dim = 32, 16
    batch = 8

    key = jax.random.PRNGKey(0)
    k_u, k_h, k_u2 = jax.random.split(key, 3)

    u = jax.random.normal(k_u, (batch, x_dim), dtype=jnp.float32)
    H = jax.random.normal(k_h, (y_dim, x_dim), dtype=jnp.float32)  # nn.Parameter H

    # Exercise the Pallas kernel (force it past the tiny-problem fast path).
    out = jax.block_until_ready(linear_forward(u, H, force_pallas=True))
    ref = u @ H.T
    assert out.shape == (batch, y_dim)
    assert jnp.allclose(out, ref, atol=1e-5, rtol=1e-5)

    # Arbitrary leading dims (flattened batch = 15, exercises full-extent /
    # partial-block handling) + caller-cached Ht path.
    u3 = jax.random.normal(k_u2, (3, 5, x_dim), dtype=jnp.float32)
    ht_cached = H.T
    out3 = jax.block_until_ready(
        linear_forward(u3, H, ht=ht_cached, force_pallas=True))
    ref3 = u3 @ H.T
    assert out3.shape == (3, 5, y_dim)
    assert jnp.allclose(out3, ref3, atol=1e-5, rtol=1e-5)

    # Tiny-problem fast path (plain XLA matmul) — same semantics.
    out_fast = jax.block_until_ready(linear_forward(u, H))
    assert jnp.allclose(out_fast, ref, atol=1e-5, rtol=1e-5)

    print("KERNEL_OK")
</pallas_src>

<mosaic_0001>
module attributes {stable_mosaic.version = 11 : i64} {
  func.func @_linear_kernel_inplace(%arg0: i32, %arg1: i32, %arg2: i32, %arg3: memref<8x32xf32, #tpu.memory_space<vmem>>, %arg4: memref<32x16xf32, #tpu.memory_space<vmem>>, %arg5: memref<8x16xf32, #tpu.memory_space<vmem>>) attributes {dimension_semantics = [#tpu.dimension_semantics<parallel>, #tpu.dimension_semantics<parallel>, #tpu.dimension_semantics<arbitrary>], iteration_bounds = array<i64: 1, 1, 1>, scalar_prefetch = 0 : i64, scratch_operands = 0 : i64, tpu.core_type = #tpu.core_type<tc>, window_params = [{transform_indices = @transform_0, window_bounds = array<i64: 8, 32>}, {transform_indices = @transform_1, window_bounds = array<i64: 32, 16>}, {transform_indices = @transform_2, window_bounds = array<i64: 8, 16>}]} {
    %c0_i32 = arith.constant 0 : i32
    %0 = arith.cmpi eq, %arg2, %c0_i32 : i32
    %1 = arith.extui %0 : i1 to i32
    %c0_i32_0 = arith.constant 0 : i32
    %2 = arith.cmpi ne, %1, %c0_i32_0 : i32
    scf.if %2 {
      %cst_8 = arith.constant 0.000000e+00 : f32
      %9 = vector.broadcast %cst_8 : f32 to vector<8x16xf32>
      %c0_9 = arith.constant 0 : index
      %c0_10 = arith.constant 0 : index
      %10 = vector.load %arg5[%c0_9, %c0_10] : memref<8x16xf32, #tpu.memory_space<vmem>>, vector<8x16xf32>
      tpu.vector_store %arg5[%c0_9, %c0_10], %9 {strides = array<i32>} : memref<8x16xf32, #tpu.memory_space<vmem>>, vector<8x16xf32>,
    } else {
    }
    %c0 = arith.constant 0 : index
    %c0_1 = arith.constant 0 : index
    %3 = vector.load %arg5[%c0, %c0_1] : memref<8x16xf32, #tpu.memory_space<vmem>>, vector<8x16xf32>
    %c0_2 = arith.constant 0 : index
    %c0_3 = arith.constant 0 : index
    %4 = vector.load %arg3[%c0_2, %c0_3] : memref<8x32xf32, #tpu.memory_space<vmem>>, vector<8x32xf32>
    %c0_4 = arith.constant 0 : index
    %c0_5 = arith.constant 0 : index
    %5 = vector.load %arg4[%c0_4, %c0_5] : memref<32x16xf32, #tpu.memory_space<vmem>>, vector<32x16xf32>
    %cst = arith.constant dense<0.000000e+00> : vector<8x16xf32>
    %6 = tpu.matmul %4, %5, %cst {dimension_numbers = #tpu.dot_dimension_numbers<[1], [0], [0], [1], [0, 0, 1, 1], [], []>} : vector<8x32xf32>, vector<32x16xf32>, vector<8x16xf32> -> vector<8x16xf32>
    %7 = arith.addf %3, %6 : vector<8x16xf32>
    %c0_6 = arith.constant 0 : index
    %c0_7 = arith.constant 0 : index
    %8 = vector.load %arg5[%c0_6, %c0_7] : memref<8x16xf32, #tpu.memory_space<vmem>>, vector<8x16xf32>
    tpu.vector_store %arg5[%c0_6, %c0_7], %7 {strides = array<i32>} : memref<8x16xf32, #tpu.memory_space<vmem>>, vector<8x16xf32>,
    return
  }
  func.func @transform_0(%arg0: i32, %arg1: i32, %arg2: i32) -> (i32, i32) {
    %c0_i32 = arith.constant 0 : i32
    return %arg0, %arg2 : i32, i32
  }
  func.func @transform_1(%arg0: i32, %arg1: i32, %arg2: i32) -> (i32, i32) {
    %c0_i32 = arith.constant 0 : i32
    return %arg2, %arg1 : i32, i32
  }
  func.func @transform_2(%arg0: i32, %arg1: i32, %arg2: i32) -> (i32, i32) {
    %c0_i32 = arith.constant 0 : i32
    return %arg0, %arg1 : i32, i32
  }
}

</mosaic_0001>

<bundles_post_ra>
// kernel: tpu_custom_call.1
= control target key start
LH: loop header
LB: loop body
LE: loop exit
PB: predicated region body
PF: predicated region fallthrough
CT: control target
= control target key end

     0   :  { %vm16_vm0 = vcmask 130048   ;;  %v166_v3 = vmov 0.0|0.0   ;;  %v167_v6 = vmov 0.0   ;;  %s214_s0 = inlined_call_operand.vmem [shape: f32[8,32], index: 0, kind: input, shape index: {}]   ;;  %s215_s1 = inlined_call_operand.vmem [shape: f32[32,16], index: 1, kind: input, shape index: {}]   ;;  %s216_s2 = inlined_call_operand.hbm [shape: f32[8,16], index: 2, kind: output, shape index: {}]  }
   0x1   :  { %v20_v0 = vld [vmem:[%s215_s1] sm:$0xff]  ;;  %v21_v1 = vld [vmem:[%s215_s1 + $0x8] sm:$0xff]  ;;  %v22_v2 = vld [vmem:[%s215_s1 + $0x10] sm:$0xff]  ;;  %132 = vmatprep.subr.bf16.mxu0 %v166_v3  ;;  %17 = vst.msk [vmem:[#allocation2] sm:$0xff] %vm16_vm0, %v167_v6 }
   0x2   :  { %v133_v4 = vpack.c.bf16 %v21_v1, %v20_v0  ;;  %v23_v5 = vld [vmem:[%s215_s1 + $0x18] sm:$0xff] }
   0x3   :  { %7 = vsyncpa [#allocation3], 0  ;;  %vm168_vm1 = vmmov 0   ;;  %v136_v7 = vpack.c.bf16 %v23_v5, %v22_v2  ;;  %v19_v8 = vld [vmem:[%s214_s0] sm:$0xff]  ;;  %vm24_vm2 = vcmask 261120   ;;  %s169_s19 = smov [#allocation2]  }
   0x4   :  { %129 = vmatprep.mubr.msk.f32.mxu0 %vm168_vm1, %v167_v6  ;;  %134 = vmatpush3.bf16.msra.mxu0 %v133_v4  ;;  %s107_s20 = sshll.u32 %s169_s19, 4  ;;  %s108_s20 = int_to_ptr.vmem [resolvable:$true] %s107_s20 }
   0x5   :  { %135 = vmatprep.subr.bf16.mxu0 %v166_v3  ;;  %s142_s1 = scalar_lea.vmem %s108_s20, 128  ;;  %p147_p1 = scmp.lt.s32.totalorder %s108_s20, %s108_s20 }
   0x6   :  { %p143_p0 = scmp.ne.s32.totalorder %s108_s20, %s142_s1  ;;  %p148_p2 = scmp.lt.s32.totalorder %s142_s1, %s142_s1 }
   0x8   :  { %137 = vmatpush3.bf16.msra.mxu0 %v136_v7  ;;  %v18_v9 = vld [vmem:[#allocation2] sm:$0xff]  ;;  %p149_p3 = por %p148_p2, %p147_p1 }
   0xa   :  { %p150_p4 = pnand %p149_p3, %p143_p0 }
   0xb   :  { %130 = vmatmul.mubr.msk.f32.vlgmr.msra.gmra.mrb[0].mxu0 %vm24_vm2, %v19_v8 }
  0xde   :  { %v94_v10 = vpop.f32.mrb[0].mxu0 }
  0xdf   :  { %v98_v11 = vadd.f32 %v94_v10, %v18_v9  ;;  %v131_v12 = vpop.f32.mrb[1].mxu0 }
  0xe1   :  { %100 = vst.msk [vmem:[#allocation2] sm:$0xff] %vm16_vm0, %v98_v11 }
  0xe2   :  { %153 = shalt.err (!%p150_p4)
}
  0xe3   :  { %s154_s22 = scalar_lea.hbm %s216_s2, 128 }
  0xe4   :  { %p155_p5 = scmp.ne.s32.totalorder %s216_s2, %s154_s22  ;;  %p158_p6 = scmp.lt.u32.totalorder %s154_s22, %s216_s2 }
  0xe6   :  { %p160_p7 = pnand %p158_p6, %p155_p5 }
  0xe8   :  { %163 = shalt.err (!%p160_p7)
}
  0xe9   :  { %110 = dma.vmem_to_hbm [thread:$0]  %s108_s20, 128, %s216_s2, [#allocation3]  }
  0xea   :  { %164 = dma.done.wait [#allocation3], 128  }
  0xeb   :  { %165 = vsyncadd [#allocation3], 4294967168 }
  0xec   :  { %114 = vsyncpa [#allocation3], 1 }

</bundles_post_ra>
